<compile_context>
chip_gen: v7x
topology: tpu7x:2x2x1
jax: 0.10.0
libtpu: 0.0.40
codegen_flags: <defaults>
</compile_context>

<pallas_src>
import math
from functools import partial

import jax
import jax.numpy as jnp
from jax import lax
from jax.experimental import pallas as pl
from jax.experimental.pallas import tpu as pltpu


# ---------------------------------------------------------------------------
# Fused kernel: backbone Linear -> Linear -> BatchNorm1d (batch stats) -> ReLU
#               -> Linear, all resident in VMEM.
# Grid: (d_in // tk,) — reduction over the backbone's input features only.
# ---------------------------------------------------------------------------
def _fused_netwrapper_kernel(x_ref, netw_ref, netb_ref,
                             w1_ref, b1_ref, g_ref, bt_ref,
                             w2_ref, b2_ref,
                             o_ref, rep_acc, *, eps):
    k = pl.program_id(0)

    # Initialise the backbone accumulator with the broadcast bias (removes the
    # bias add from the finalize path).
    @pl.when(k == 0)
    def _():
        rep_acc[...] = jnp.broadcast_to(netb_ref[...], rep_acc.shape)

    # Backbone Linear: bf16 operands, f32 accumulation on the MXU.
    rep_acc[...] += jnp.dot(x_ref[...], netw_ref[...],
                            preferred_element_type=jnp.float32)

    @pl.when(k == pl.num_programs(0) - 1)
    def _():
        rep = rep_acc[...]                                        # (N, rep) f32

        # Projector Linear 1 (bf16 operands, f32 accumulate).
        h = jnp.dot(rep.astype(w1_ref.dtype), w1_ref[...],
                    preferred_element_type=jnp.float32) + b1_ref[...]

        # BatchNorm1d, training-mode batch statistics (exact: whole batch is
        # resident in this block).  Biased variance, like torch.
        mean = jnp.mean(h, axis=0, keepdims=True)
        diff = h - mean
        var = jnp.mean(diff * diff, axis=0, keepdims=True)
        y = diff * lax.rsqrt(var + eps) * g_ref[...] + bt_ref[...]

        # ReLU.
        y = jnp.maximum(y, 0.0)

        # Projector Linear 2.
        out = jnp.dot(y.astype(w2_ref.dtype), w2_ref[...],
                      preferred_element_type=jnp.float32) + b2_ref[...]
        o_ref[...] = out.astype(o_ref.dtype)


# ---------------------------------------------------------------------------
# Wrapper
# ---------------------------------------------------------------------------
def _pick_tile(dim, target, align):
    """Largest tile <= target that divides `dim` and is a multiple of `align`;
    falls back to the full dim (always a legal block)."""
    if dim <= target or dim % align != 0:
        return dim
    t = (target // align) * align
    while t >= align:
        if dim % t == 0:
            return t
        t -= align
    return dim


def netwrapper_forward(x, params, *, eps=1e-5, compute_dtype=jnp.bfloat16):
    """NetWrapper.forward(x, return_projection=True), layer == -1."""
    N = x.shape[0]
    x2 = x.reshape(N, -1)
    d_in = x2.shape[1]
    rep_dim = params["net_w"].shape[1]
    hidden = params["w1"].shape[1]
    proj = params["w2"].shape[1]

    # bf16 matmul operands (half the HBM weight stream, 2x MXU rate on
    # v6e/v7x); biases / BN params / accumulators / output stay f32.
    x2 = x2.astype(compute_dtype)
    net_w = params["net_w"].astype(compute_dtype)
    w1 = params["w1"].astype(compute_dtype)
    w2 = params["w2"].astype(compute_dtype)
    net_b = params["net_b"].reshape(1, rep_dim).astype(jnp.float32)
    b1 = params["b1"].reshape(1, hidden).astype(jnp.float32)
    g = params["gamma"].reshape(1, hidden).astype(jnp.float32)
    bt = params["beta"].reshape(1, hidden).astype(jnp.float32)
    b2 = params["b2"].reshape(1, proj).astype(jnp.float32)

    tk = _pick_tile(d_in, 1024, 128)       # large reduction tile, few grid steps
    grid = (d_in // tk,)

    itm = jnp.dtype(compute_dtype).itemsize
    flops = 2 * N * (d_in * rep_dim + rep_dim * hidden + hidden * proj) + 8 * N * hidden
    bytes_accessed = (N * d_in * itm + d_in * rep_dim * itm
                      + rep_dim * hidden * itm + hidden * proj * itm
                      + 4 * (rep_dim + 3 * hidden + proj) + 4 * N * proj)

    return pl.pallas_call(
        partial(_fused_netwrapper_kernel, eps=eps),
        out_shape=jax.ShapeDtypeStruct((N, proj), jnp.float32),
        grid_spec=pltpu.PrefetchScalarGridSpec(
            num_scalar_prefetch=0,
            grid=grid,
            in_specs=[
                pl.BlockSpec((N, tk), lambda k: (0, k)),          # x (streamed over K)
                pl.BlockSpec((tk, rep_dim), lambda k: (k, 0)),    # net_w (streamed over K)
                pl.BlockSpec((1, rep_dim), lambda k: (0, 0)),     # net_b
                pl.BlockSpec((rep_dim, hidden), lambda k: (0, 0)),  # w1 (resident)
                pl.BlockSpec((1, hidden), lambda k: (0, 0)),      # b1
                pl.BlockSpec((1, hidden), lambda k: (0, 0)),      # gamma
                pl.BlockSpec((1, hidden), lambda k: (0, 0)),      # beta
                pl.BlockSpec((hidden, proj), lambda k: (0, 0)),   # w2 (resident)
                pl.BlockSpec((1, proj), lambda k: (0, 0)),        # b2
            ],
            out_specs=pl.BlockSpec((N, proj), lambda k: (0, 0)),
            scratch_shapes=[pltpu.VMEM((N, rep_dim), jnp.float32)],
        ),
        compiler_params=pltpu.CompilerParams(
            dimension_semantics=("arbitrary",)),
        cost_estimate=pl.CostEstimate(flops=int(flops), transcendentals=int(hidden),
                                      bytes_accessed=int(bytes_accessed)),
    )(x2, net_w, net_b, w1, b1, g, bt, w2, b2)


if __name__ == "__main__":
    key = jax.random.PRNGKey(0)
    ks = jax.random.split(key, 9)

    N, C, H, W = 8, 4, 16, 16
    rep_dim, hidden_size, projection_size = 128, 256, 128
    d_in = C * H * W  # 1024

    x = jax.random.normal(ks[0], (N, C, H, W), dtype=jnp.float32)
    params = {
        "net_w": jax.random.normal(ks[1], (d_in, rep_dim), jnp.float32) / math.sqrt(d_in),
        "net_b": 0.1 * jax.random.normal(ks[2], (rep_dim,), jnp.float32),
        "w1": jax.random.normal(ks[3], (rep_dim, hidden_size), jnp.float32) / math.sqrt(rep_dim),
        "b1": 0.1 * jax.random.normal(ks[4], (hidden_size,), jnp.float32),
        "gamma": 1.0 + 0.1 * jax.random.normal(ks[5], (hidden_size,), jnp.float32),
        "beta": 0.1 * jax.random.normal(ks[6], (hidden_size,), jnp.float32),
        "w2": jax.random.normal(ks[7], (hidden_size, projection_size), jnp.float32) / math.sqrt(hidden_size),
        "b2": 0.1 * jax.random.normal(ks[8], (projection_size,), jnp.float32),
    }

    fwd = jax.jit(netwrapper_forward)
    out = jax.block_until_ready(fwd(x, params))
    assert out.shape == (N, projection_size) and out.dtype == jnp.float32

    # Reference 1: identical math with the same bf16 operand quantization
    # (tests the kernel implementation itself).
    bf = jnp.bfloat16
    xb = x.reshape(N, -1).astype(bf)
    rep = jnp.dot(xb, params["net_w"].astype(bf),
                  preferred_element_type=jnp.float32) + params["net_b"]
    h = jnp.dot(rep.astype(bf), params["w1"].astype(bf),
                preferred_element_type=jnp.float32) + params["b1"]
    mean = h.mean(axis=0, keepdims=True)
    var = ((h - mean) ** 2).mean(axis=0, keepdims=True)
    h = (h - mean) / jnp.sqrt(var + 1e-5) * params["gamma"] + params["beta"]
    h = jnp.maximum(h, 0.0)
    ref_q = jnp.dot(h.astype(bf), params["w2"].astype(bf),
                    preferred_element_type=jnp.float32) + params["b2"]
    err_q = float(jnp.max(jnp.abs(out - ref_q)))
    assert jnp.allclose(out, ref_q, atol=1e-2, rtol=1e-2), f"bf16-ref max abs err {err_q}"

    # Reference 2: full-f32 PyTorch-semantics forward (loose sanity bound —
    # the gap is the expected bf16 operand quantization).
    hp = jax.lax.Precision.HIGHEST
    rep32 = jnp.dot(x.reshape(N, -1), params["net_w"], precision=hp) + params["net_b"]
    h32 = jnp.dot(rep32, params["w1"], precision=hp) + params["b1"]
    m32 = h32.mean(axis=0, keepdims=True)
    v32 = ((h32 - m32) ** 2).mean(axis=0, keepdims=True)
    h32 = (h32 - m32) / jnp.sqrt(v32 + 1e-5) * params["gamma"] + params["beta"]
    h32 = jnp.maximum(h32, 0.0)
    ref32 = jnp.dot(h32, params["w2"], precision=hp) + params["b2"]
    err32 = float(jnp.max(jnp.abs(out - ref32)))
    assert jnp.allclose(out, ref32, atol=1.5e-1, rtol=1.5e-1), f"f32-ref max abs err {err32}"

    print("KERNEL_OK")
</pallas_src>

<mosaic_0001>
module attributes {stable_mosaic.version = 11 : i64} {
  func.func @_fused_netwrapper_kernel(%arg0: i32, %arg1: memref<8x1024xbf16, #tpu.memory_space<vmem>>, %arg2: memref<1024x128xbf16, #tpu.memory_space<vmem>>, %arg3: memref<1x128xf32, #tpu.memory_space<vmem>>, %arg4: memref<128x256xbf16, #tpu.memory_space<vmem>>, %arg5: memref<1x256xf32, #tpu.memory_space<vmem>>, %arg6: memref<1x256xf32, #tpu.memory_space<vmem>>, %arg7: memref<1x256xf32, #tpu.memory_space<vmem>>, %arg8: memref<256x128xbf16, #tpu.memory_space<vmem>>, %arg9: memref<1x128xf32, #tpu.memory_space<vmem>>, %arg10: memref<8x128xf32, #tpu.memory_space<vmem>>, %arg11: memref<8x128xf32, #tpu.memory_space<vmem>>) attributes {dimension_semantics = [#tpu.dimension_semantics<arbitrary>], iteration_bounds = array<i64: 1>, scalar_prefetch = 0 : i64, scratch_operands = 1 : i64, tpu.core_type = #tpu.core_type<tc>, window_params = [{transform_indices = @transform_0, window_bounds = array<i64: 8, 1024>}, {transform_indices = @transform_1, window_bounds = array<i64: 1024, 128>}, {pipeline_mode = #tpu.pipeline_mode<synchronous>, transform_indices = @transform_2, window_bounds = array<i64: 1, 128>}, {pipeline_mode = #tpu.pipeline_mode<synchronous>, transform_indices = @transform_3, window_bounds = array<i64: 128, 256>}, {pipeline_mode = #tpu.pipeline_mode<synchronous>, transform_indices = @transform_4, window_bounds = array<i64: 1, 256>}, {pipeline_mode = #tpu.pipeline_mode<synchronous>, transform_indices = @transform_5, window_bounds = array<i64: 1, 256>}, {pipeline_mode = #tpu.pipeline_mode<synchronous>, transform_indices = @transform_6, window_bounds = array<i64: 1, 256>}, {pipeline_mode = #tpu.pipeline_mode<synchronous>, transform_indices = @transform_7, window_bounds = array<i64: 256, 128>}, {pipeline_mode = #tpu.pipeline_mode<synchronous>, transform_indices = @transform_8, window_bounds = array<i64: 1, 128>}, {pipeline_mode = #tpu.pipeline_mode<synchronous>, transform_indices = @transform_9, window_bounds = array<i64: 8, 128>}]} {
    %c0_i32 = arith.constant 0 : i32
    %0 = arith.cmpi eq, %arg0, %c0_i32 : i32
    %1 = arith.extui %0 : i1 to i32
    %c0_i32_0 = arith.constant 0 : i32
    %2 = arith.cmpi ne, %1, %c0_i32_0 : i32
    scf.if %2 {
      %c0_10 = arith.constant 0 : index
      %c0_11 = arith.constant 0 : index
      %12 = vector.load %arg3[%c0_10, %c0_11] : memref<1x128xf32, #tpu.memory_space<vmem>>, vector<1x128xf32>
      %13 = vector.shape_cast %12 : vector<1x128xf32> to vector<1x128xf32>
      %14 = vector.broadcast %13 : vector<1x128xf32> to vector<8x128xf32>
      %c0_12 = arith.constant 0 : index
      %c0_13 = arith.constant 0 : index
      %15 = vector.load %arg11[%c0_12, %c0_13] : memref<8x128xf32, #tpu.memory_space<vmem>>, vector<8x128xf32>
      tpu.vector_store %arg11[%c0_12, %c0_13], %14 {strides = array<i32>} : memref<8x128xf32, #tpu.memory_space<vmem>>, vector<8x128xf32>,
    } else {
    }
    %c0 = arith.constant 0 : index
    %c0_1 = arith.constant 0 : index
    %3 = vector.load %arg11[%c0, %c0_1] : memref<8x128xf32, #tpu.memory_space<vmem>>, vector<8x128xf32>
    %c0_2 = arith.constant 0 : index
    %c0_3 = arith.constant 0 : index
    %4 = vector.load %arg1[%c0_2, %c0_3] : memref<8x1024xbf16, #tpu.memory_space<vmem>>, vector<8x1024xbf16>
    %c0_4 = arith.constant 0 : index
    %c0_5 = arith.constant 0 : index
    %5 = vector.load %arg2[%c0_4, %c0_5] : memref<1024x128xbf16, #tpu.memory_space<vmem>>, vector<1024x128xbf16>
    %cst = arith.constant dense<0.000000e+00> : vector<8x128xf32>
    %6 = tpu.matmul %4, %5, %cst {dimension_numbers = #tpu.dot_dimension_numbers<[1], [0], [0], [1], [0, 0, 1, 1], [], []>} : vector<8x1024xbf16>, vector<1024x128xbf16>, vector<8x128xf32> -> vector<8x128xf32>
    %7 = arith.addf %3, %6 : vector<8x128xf32>
    %c0_6 = arith.constant 0 : index
    %c0_7 = arith.constant 0 : index
    %8 = vector.load %arg11[%c0_6, %c0_7] : memref<8x128xf32, #tpu.memory_space<vmem>>, vector<8x128xf32>
    tpu.vector_store %arg11[%c0_6, %c0_7], %7 {strides = array<i32>} : memref<8x128xf32, #tpu.memory_space<vmem>>, vector<8x128xf32>,
    %c0_i32_8 = arith.constant 0 : i32
    %9 = arith.cmpi eq, %arg0, %c0_i32_8 : i32
    %10 = arith.extui %9 : i1 to i32
    %c0_i32_9 = arith.constant 0 : i32
    %11 = arith.cmpi ne, %10, %c0_i32_9 : i32
    scf.if %11 {
      %c0_10 = arith.constant 0 : index
      %c0_11 = arith.constant 0 : index
      %12 = vector.load %arg11[%c0_10, %c0_11] : memref<8x128xf32, #tpu.memory_space<vmem>>, vector<8x128xf32>
      %13 = arith.truncf %12 : vector<8x128xf32> to vector<8x128xbf16>
      %c0_12 = arith.constant 0 : index
      %c0_13 = arith.constant 0 : index
      %14 = vector.load %arg4[%c0_12, %c0_13] : memref<128x256xbf16, #tpu.memory_space<vmem>>, vector<128x256xbf16>
      %cst_14 = arith.constant dense<0.000000e+00> : vector<8x256xf32>
      %15 = tpu.matmul %13, %14, %cst_14 {dimension_numbers = #tpu.dot_dimension_numbers<[1], [0], [0], [1], [0, 0, 1, 1], [], []>} : vector<8x128xbf16>, vector<128x256xbf16>, vector<8x256xf32> -> vector<8x256xf32>
      %c0_15 = arith.constant 0 : index
      %c0_16 = arith.constant 0 : index
      %16 = vector.load %arg5[%c0_15, %c0_16] : memref<1x256xf32, #tpu.memory_space<vmem>>, vector<1x256xf32>
      %17 = vector.broadcast %16 : vector<1x256xf32> to vector<8x256xf32>
      %18 = arith.addf %15, %17 : vector<8x256xf32>
      %cst_17 = arith.constant dense<0.000000e+00> : vector<256xf32>
      %19 = vector.multi_reduction <add>, %18, %cst_17 [0] : vector<8x256xf32> to vector<256xf32>
      %20 = vector.shape_cast %19 : vector<256xf32> to vector<1x256xf32>
      %cst_18 = arith.constant 8.000000e+00 : f32
      %21 = vector.broadcast %cst_18 : f32 to vector<1x256xf32>
      %22 = arith.divf %20, %21 : vector<1x256xf32>
      %23 = vector.broadcast %22 : vector<1x256xf32> to vector<8x256xf32>
      %24 = arith.subf %18, %23 : vector<8x256xf32>
      %25 = arith.mulf %24, %24 : vector<8x256xf32>
      %cst_19 = arith.constant dense<0.000000e+00> : vector<256xf32>
      %26 = vector.multi_reduction <add>, %25, %cst_19 [0] : vector<8x256xf32> to vector<256xf32>
      %27 = vector.shape_cast %26 : vector<256xf32> to vector<1x256xf32>
      %cst_20 = arith.constant 8.000000e+00 : f32
      %28 = vector.broadcast %cst_20 : f32 to vector<1x256xf32>
      %29 = arith.divf %27, %28 : vector<1x256xf32>
      %cst_21 = arith.constant 9.99999974E-6 : f32
      %30 = vector.broadcast %cst_21 : f32 to vector<1x256xf32>
      %31 = arith.addf %29, %30 : vector<1x256xf32>
      %32 = math.rsqrt %31 : vector<1x256xf32>
      %33 = vector.broadcast %32 : vector<1x256xf32> to vector<8x256xf32>
      %34 = arith.mulf %24, %33 : vector<8x256xf32>
      %c0_22 = arith.constant 0 : index
      %c0_23 = arith.constant 0 : index
      %35 = vector.load %arg6[%c0_22, %c0_23] : memref<1x256xf32, #tpu.memory_space<vmem>>, vector<1x256xf32>
      %36 = vector.broadcast %35 : vector<1x256xf32> to vector<8x256xf32>
      %37 = arith.mulf %34, %36 : vector<8x256xf32>
      %c0_24 = arith.constant 0 : index
      %c0_25 = arith.constant 0 : index
      %38 = vector.load %arg7[%c0_24, %c0_25] : memref<1x256xf32, #tpu.memory_space<vmem>>, vector<1x256xf32>
      %39 = vector.broadcast %38 : vector<1x256xf32> to vector<8x256xf32>
      %40 = arith.addf %37, %39 : vector<8x256xf32>
      %cst_26 = arith.constant 0.000000e+00 : f32
      %41 = vector.broadcast %cst_26 : f32 to vector<8x256xf32>
      %42 = arith.maximumf %40, %41 : vector<8x256xf32>
      %43 = arith.truncf %42 : vector<8x256xf32> to vector<8x256xbf16>
      %c0_27 = arith.constant 0 : index
      %c0_28 = arith.constant 0 : index
      %44 = vector.load %arg8[%c0_27, %c0_28] : memref<256x128xbf16, #tpu.memory_space<vmem>>, vector<256x128xbf16>
      %cst_29 = arith.constant dense<0.000000e+00> : vector<8x128xf32>
      %45 = tpu.matmul %43, %44, %cst_29 {dimension_numbers = #tpu.dot_dimension_numbers<[1], [0], [0], [1], [0, 0, 1, 1], [], []>} : vector<8x256xbf16>, vector<256x128xbf16>, vector<8x128xf32> -> vector<8x128xf32>
      %c0_30 = arith.constant 0 : index
      %c0_31 = arith.constant 0 : index
      %46 = vector.load %arg9[%c0_30, %c0_31] : memref<1x128xf32, #tpu.memory_space<vmem>>, vector<1x128xf32>
      %47 = vector.broadcast %46 : vector<1x128xf32> to vector<8x128xf32>
      %48 = arith.addf %45, %47 : vector<8x128xf32>
      %c0_32 = arith.constant 0 : index
      %c0_33 = arith.constant 0 : index
      %49 = vector.load %arg10[%c0_32, %c0_33] : memref<8x128xf32, #tpu.memory_space<vmem>>, vector<8x128xf32>
      tpu.vector_store %arg10[%c0_32, %c0_33], %48 {strides = array<i32>} : memref<8x128xf32, #tpu.memory_space<vmem>>, vector<8x128xf32>,
    } else {
    }
    return
  }
  func.func @transform_0(%arg0: i32) -> (i32, i32) {
    %c0_i32 = arith.constant 0 : i32
    %c0_i32_0 = arith.constant 0 : i32
    return %c0_i32, %arg0 : i32, i32
  }
  func.func @transform_1(%arg0: i32) -> (i32, i32) {
    %c0_i32 = arith.constant 0 : i32
    %c0_i32_0 = arith.constant 0 : i32
    return %arg0, %c0_i32 : i32, i32
  }
  func.func @transform_2(%arg0: i32) -> (i32, i32) {
    %c0_i32 = arith.constant 0 : i32
    %c0_i32_0 = arith.constant 0 : i32
    %c0_i32_1 = arith.constant 0 : i32
    return %c0_i32, %c0_i32_0 : i32, i32
  }
  func.func @transform_3(%arg0: i32) -> (i32, i32) {
    %c0_i32 = arith.constant 0 : i32
    %c0_i32_0 = arith.constant 0 : i32
    %c0_i32_1 = arith.constant 0 : i32
    return %c0_i32, %c0_i32_0 : i32, i32
  }
  func.func @transform_4(%arg0: i32) -> (i32, i32) {
    %c0_i32 = arith.constant 0 : i32
    %c0_i32_0 = arith.constant 0 : i32
    %c0_i32_1 = arith.constant 0 : i32
    return %c0_i32, %c0_i32_0 : i32, i32
  }
  func.func @transform_5(%arg0: i32) -> (i32, i32) {
    %c0_i32 = arith.constant 0 : i32
    %c0_i32_0 = arith.constant 0 : i32
    %c0_i32_1 = arith.constant 0 : i32
    return %c0_i32, %c0_i32_0 : i32, i32
  }
  func.func @transform_6(%arg0: i32) -> (i32, i32) {
    %c0_i32 = arith.constant 0 : i32
    %c0_i32_0 = arith.constant 0 : i32
    %c0_i32_1 = arith.constant 0 : i32
    return %c0_i32, %c0_i32_0 : i32, i32
  }
  func.func @transform_7(%arg0: i32) -> (i32, i32) {
    %c0_i32 = arith.constant 0 : i32
    %c0_i32_0 = arith.constant 0 : i32
    %c0_i32_1 = arith.constant 0 : i32
    return %c0_i32, %c0_i32_0 : i32, i32
  }
  func.func @transform_8(%arg0: i32) -> (i32, i32) {
    %c0_i32 = arith.constant 0 : i32
    %c0_i32_0 = arith.constant 0 : i32
    %c0_i32_1 = arith.constant 0 : i32
    return %c0_i32, %c0_i32_0 : i32, i32
  }
  func.func @transform_9(%arg0: i32) -> (i32, i32) {
    %c0_i32 = arith.constant 0 : i32
    %c0_i32_0 = arith.constant 0 : i32
    %c0_i32_1 = arith.constant 0 : i32
    return %c0_i32, %c0_i32_0 : i32, i32
  }
}

</mosaic_0001>

<bundles_post_ra>
// kernel: netwrapper_forward.1
= control target key start
LH: loop header
LB: loop body
LE: loop exit
PB: predicated region body
PF: predicated region fallthrough
CT: control target
= control target key end

     0   :  { %s1905_s0 = inlined_call_operand.vmem [shape: bf16[8,1024], index: 0, kind: input, shape index: {}]   ;;  %s1906_s1 = inlined_call_operand.vmem [shape: bf16[1024,128], index: 1, kind: input, shape index: {}]   ;;  %s1907_s2 = inlined_call_operand.vmem [shape: f32[1,128], index: 2, kind: input, shape index: {}]   ;;  %s1908_s3 = inlined_call_operand.vmem [shape: bf16[128,256], index: 3, kind: input, shape index: {}]   ;;  %s1909_s4 = inlined_call_operand.vmem [shape: f32[1,256], index: 4, kind: input, shape index: {}]   ;;  %s1910_s5 = inlined_call_operand.vmem [shape: f32[1,256], index: 5, kind: input, shape index: {}]   ;;  %s1911_s6 = inlined_call_operand.vmem [shape: f32[1,256], index: 6, kind: input, shape index: {}]   ;;  %s1912_s7 = inlined_call_operand.vmem [shape: bf16[256,128], index: 7, kind: input, shape index: {}]   ;;  %s1913_s8 = inlined_call_operand.vmem [shape: f32[1,128], index: 8, kind: input, shape index: {}]   ;;  %s1914_s9 = inlined_call_operand.hbm [shape: f32[8,128], index: 9, kind: output, shape index: {}]  }
   0x1   :  { %v1386_v0 = vld [vmem:[%s1906_s1 + $0x40] sm:$0xff]   ;;  %v1390_v4 = vld [vmem:[%s1906_s1 + $0x48] sm:$0xff]   ;;  %v1394_v8 = vld [vmem:[%s1906_s1 + $0x50] sm:$0xff]  }
   0x2   :  { %v1387_v1 = vld [vmem:[%s1906_s1 + $0xc0] sm:$0xff]   ;;  %1274 = vmatprep.subr.bf16.mxu0 %v1386_v0  ;;  %v1391_v5 = vld [vmem:[%s1906_s1 + $0xc8] sm:$0xff]   ;;  %v1395_v9 = vld [vmem:[%s1906_s1 + $0xd0] sm:$0xff]  }
   0x3   :  { %v1388_v2 = vld [vmem:[%s1906_s1] sm:$0xff]   ;;  %1296 = vmatprep.subr.bf16.mxu1 %v1387_v1  ;;  %v1392_v6 = vld [vmem:[%s1906_s1 + $0x8] sm:$0xff]   ;;  %v1396_v10 = vld [vmem:[%s1906_s1 + $0x10] sm:$0xff]  }
   0x4   :  { %v1389_v3 = vld [vmem:[%s1906_s1 + $0x80] sm:$0xff]   ;;  %1275 = vmatpush3.bf16.msra.mxu0 %v1388_v2  ;;  %v1393_v7 = vld [vmem:[%s1906_s1 + $0x88] sm:$0xff]   ;;  %v1397_v11 = vld [vmem:[%s1906_s1 + $0x90] sm:$0xff]  }
   0x5   :  { %1297 = vmatpush3.bf16.msra.mxu1 %v1389_v3  ;;  %1276 = vmatprep.subr.bf16.mxu0 %v1390_v4  ;;  %v1398_v12 = vld [vmem:[%s1906_s1 + $0x58] sm:$0xff]   ;;  %v1402_v16 = vld [vmem:[%s1906_s1 + $0x60] sm:$0xff]   ;;  %v1406_v20 = vld [vmem:[%s1906_s1 + $0x68] sm:$0xff]  }
   0x6   :  { %1298 = vmatprep.subr.bf16.mxu1 %v1391_v5  ;;  %v1399_v13 = vld [vmem:[%s1906_s1 + $0xd8] sm:$0xff]   ;;  %v1403_v17 = vld [vmem:[%s1906_s1 + $0xe0] sm:$0xff]   ;;  %v1407_v21 = vld [vmem:[%s1906_s1 + $0xe8] sm:$0xff]  }
   0x7   :  { %v1400_v14 = vld [vmem:[%s1906_s1 + $0x18] sm:$0xff]   ;;  %v1404_v18 = vld [vmem:[%s1906_s1 + $0x20] sm:$0xff]   ;;  %v1408_v22 = vld [vmem:[%s1906_s1 + $0x28] sm:$0xff]  }
   0x8   :  { %1277 = vmatpush3.bf16.msra.mxu0 %v1392_v6  ;;  %v1401_v15 = vld [vmem:[%s1906_s1 + $0x98] sm:$0xff]   ;;  %v1405_v19 = vld [vmem:[%s1906_s1 + $0xa0] sm:$0xff]   ;;  %v1409_v23 = vld [vmem:[%s1906_s1 + $0xa8] sm:$0xff]  }
   0x9   :  { %1299 = vmatpush3.bf16.msra.mxu1 %v1393_v7  ;;  %1278 = vmatprep.subr.bf16.mxu0 %v1394_v8  ;;  %v1410_v24 = vld [vmem:[%s1906_s1 + $0x70] sm:$0xff]   ;;  %v1414_v28 = vld [vmem:[%s1906_s1 + $0x78] sm:$0xff]   ;;  %v47_v32 = vld [vmem:[%s1905_s0] sm:$0xff] }
   0xa   :  { %1300 = vmatprep.subr.bf16.mxu1 %v1395_v9  ;;  %v1411_v25 = vld [vmem:[%s1906_s1 + $0xf0] sm:$0xff]   ;;  %v1415_v29 = vld [vmem:[%s1906_s1 + $0xf8] sm:$0xff]   ;;  %v48_v33 = vld [vmem:[%s1905_s0 + $0x8] sm:$0xff]  ;;  %v1169_v34 = vcombine.low %v47_v32, %v47_v32  ;;  %v1170_v35 = vcombine.high %v47_v32, %v47_v32 }
   0xb   :  { %v1412_v26 = vld [vmem:[%s1906_s1 + $0x30] sm:$0xff]   ;;  %v1416_v30 = vld [vmem:[%s1906_s1 + $0x38] sm:$0xff]   ;;  %v1171_v36 = vcombine.low %v48_v33, %v48_v33  ;;  %v1172_v37 = vcombine.high %v48_v33, %v48_v33  ;;  %v1422_v38 = vld [vmem:[%s1906_s1 + $0x140] sm:$0xff]  }
   0xc   :  { %1279 = vmatpush3.bf16.msra.mxu0 %v1396_v10  ;;  %v1413_v27 = vld [vmem:[%s1906_s1 + $0xb0] sm:$0xff]   ;;  %v1417_v31 = vld [vmem:[%s1906_s1 + $0xb8] sm:$0xff]   ;;  %v1423_v39 = vld [vmem:[%s1906_s1 + $0x1c0] sm:$0xff]   ;;  %623 = vmatprep.mubr.bf16.mxu0 %v1170_v35 }
   0xd   :  { %1301 = vmatpush3.bf16.msra.mxu1 %v1397_v11  ;;  %1280 = vmatprep.subr.bf16.mxu0 %v1398_v12  ;;  %v1424_v40 = vld [vmem:[%s1906_s1 + $0x100] sm:$0xff]   ;;  %v1426_v42 = vld [vmem:[%s1906_s1 + $0x148] sm:$0xff]   ;;  %v1430_v46 = vld [vmem:[%s1906_s1 + $0x150] sm:$0xff]  }
   0xe   :  { %1302 = vmatprep.subr.bf16.mxu1 %v1399_v13  ;;  %663 = vmatprep.mubr.bf16.mxu1 %v1172_v37  ;;  %v1425_v41 = vld [vmem:[%s1906_s1 + $0x180] sm:$0xff]   ;;  %v1427_v43 = vld [vmem:[%s1906_s1 + $0x1c8] sm:$0xff]   ;;  %v1431_v47 = vld [vmem:[%s1906_s1 + $0x1d0] sm:$0xff]  }
   0xf   :  { %v1428_v44 = vld [vmem:[%s1906_s1 + $0x108] sm:$0xff]   ;;  %v1432_v48 = vld [vmem:[%s1906_s1 + $0x110] sm:$0xff]   ;;  %v1434_v50 = vld [vmem:[%s1906_s1 + $0x158] sm:$0xff]  }
  0x10   :  { %1281 = vmatpush3.bf16.msra.mxu0 %v1400_v14  ;;  %v1429_v45 = vld [vmem:[%s1906_s1 + $0x188] sm:$0xff]   ;;  %v1433_v49 = vld [vmem:[%s1906_s1 + $0x190] sm:$0xff]   ;;  %v1435_v51 = vld [vmem:[%s1906_s1 + $0x1d8] sm:$0xff]  }
  0x11   :  { %1303 = vmatpush3.bf16.msra.mxu1 %v1401_v15  ;;  %1282 = vmatprep.subr.bf16.mxu0 %v1402_v16  ;;  %v1436_v52 = vld [vmem:[%s1906_s1 + $0x118] sm:$0xff]   ;;  %v1438_v54 = vld [vmem:[%s1906_s1 + $0x160] sm:$0xff]   ;;  %v1442_v58 = vld [vmem:[%s1906_s1 + $0x168] sm:$0xff]  }
  0x12   :  { %1304 = vmatprep.subr.bf16.mxu1 %v1403_v17  ;;  %v1437_v53 = vld [vmem:[%s1906_s1 + $0x198] sm:$0xff]   ;;  %v1439_v55 = vld [vmem:[%s1906_s1 + $0x1e0] sm:$0xff]   ;;  %v1443_v59 = vld [vmem:[%s1906_s1 + $0x1e8] sm:$0xff]  }
  0x13   :  { %v1440_v56 = vld [vmem:[%s1906_s1 + $0x120] sm:$0xff]   ;;  %v1444_v60 = vld [vmem:[%s1906_s1 + $0x128] sm:$0xff]   ;;  %v1446_v62 = vld [vmem:[%s1906_s1 + $0x170] sm:$0xff]  }
  0x14   :  { %1283 = vmatpush3.bf16.msra.mxu0 %v1404_v18  ;;  %v1441_v57 = vld [vmem:[%s1906_s1 + $0x1a0] sm:$0xff]   ;;  %v1445_v61 = vld [vmem:[%s1906_s1 + $0x1a8] sm:$0xff]   ;;  %v1447_v63 = vld [vmem:[%s1906_s1 + $0x1f0] sm:$0xff]  }
  0x15   :  { %1305 = vmatpush3.bf16.msra.mxu1 %v1405_v19  ;;  %1284 = vmatprep.subr.bf16.mxu0 %v1406_v20  ;;  %v1448_v0 = vld [vmem:[%s1906_s1 + $0x130] sm:$0xff]   ;;  %v1450_v2 = vld [vmem:[%s1906_s1 + $0x178] sm:$0xff]  }
  0x16   :  { %1306 = vmatprep.subr.bf16.mxu1 %v1407_v21  ;;  %v1449_v1 = vld [vmem:[%s1906_s1 + $0x1b0] sm:$0xff]   ;;  %v1451_v3 = vld [vmem:[%s1906_s1 + $0x1f8] sm:$0xff]  }
  0x17   :  { %v1452_v4 = vld [vmem:[%s1906_s1 + $0x138] sm:$0xff]   ;;  %v49_v6 = vld [vmem:[%s1905_s0 + $0x10] sm:$0xff] }
  0x18   :  { %1285 = vmatpush3.bf16.msra.mxu0 %v1408_v22  ;;  %v1453_v5 = vld [vmem:[%s1906_s1 + $0x1b8] sm:$0xff]   ;;  %v1173_v7 = vcombine.low %v49_v6, %v49_v6  ;;  %v1174_v8 = vcombine.high %v49_v6, %v49_v6 }
  0x19   :  { %1307 = vmatpush3.bf16.msra.mxu1 %v1409_v23  ;;  %1286 = vmatprep.subr.bf16.mxu0 %v1410_v24  ;;  %v50_v9 = vld [vmem:[%s1905_s0 + $0x18] sm:$0xff] }
  0x1a   :  { %1308 = vmatprep.subr.bf16.mxu1 %v1411_v25  ;;  %v1175_v10 = vcombine.low %v50_v9, %v50_v9  ;;  %v1176_v11 = vcombine.high %v50_v9, %v50_v9 }
  0x1c   :  { %1287 = vmatpush3.bf16.msra.mxu0 %v1412_v26 }
  0x1d   :  { %1309 = vmatpush3.bf16.msra.mxu1 %v1413_v27  ;;  %1288 = vmatprep.subr.bf16.mxu0 %v1414_v28 }
  0x1e   :  { %1310 = vmatprep.subr.bf16.mxu1 %v1415_v29 }
  0x20   :  { %1289 = vmatpush3.bf16.msra.mxu0 %v1416_v30 }
  0x21   :  { %1311 = vmatpush3.bf16.msra.mxu1 %v1417_v31  ;;  %1318 = vmatprep.subr.bf16.mxu0 %v1422_v38 }
  0x22   :  { %1340 = vmatprep.subr.bf16.mxu1 %v1423_v39 }
  0x23   :  { %624 = vmatmul.mubr.bf16.vlgmr.msra.gmra.mrb[0].mxu0 %v1169_v34 }
  0x24   :  { %664 = vmatmul.mubr.bf16.vlgmr.msra.gmra.mrb[0].mxu1 %v1171_v36  ;;  %1319 = vmatpush3.bf16.msra.mxu0 %v1424_v40 }
  0x25   :  { %1341 = vmatpush3.bf16.msra.mxu1 %v1425_v41  ;;  %1320 = vmatprep.subr.bf16.mxu0 %v1426_v42 }
  0x26   :  { %1342 = vmatprep.subr.bf16.mxu1 %v1427_v43  ;;  %703 = vmatprep.mubr.bf16.mxu0 %v1174_v8 }
  0x27   :  { %743 = vmatprep.mubr.bf16.mxu1 %v1176_v11 }
  0x28   :  { %1321 = vmatpush3.bf16.msra.mxu0 %v1428_v44 }
  0x29   :  { %1343 = vmatpush3.bf16.msra.mxu1 %v1429_v45  ;;  %1322 = vmatprep.subr.bf16.mxu0 %v1430_v46 }
  0x2a   :  { %1344 = vmatprep.subr.bf16.mxu1 %v1431_v47 }
  0x2c   :  { %1323 = vmatpush3.bf16.msra.mxu0 %v1432_v48 }
  0x2d   :  { %1345 = vmatpush3.bf16.msra.mxu1 %v1433_v49  ;;  %1324 = vmatprep.subr.bf16.mxu0 %v1434_v50 }
  0x2e   :  { %1346 = vmatprep.subr.bf16.mxu1 %v1435_v51 }
  0x30   :  { %1325 = vmatpush3.bf16.msra.mxu0 %v1436_v52 }
  0x31   :  { %1347 = vmatpush3.bf16.msra.mxu1 %v1437_v53  ;;  %1326 = vmatprep.subr.bf16.mxu0 %v1438_v54 }
  0x32   :  { %1348 = vmatprep.subr.bf16.mxu1 %v1439_v55 }
  0x34   :  { %1327 = vmatpush3.bf16.msra.mxu0 %v1440_v56 }
  0x35   :  { %1349 = vmatpush3.bf16.msra.mxu1 %v1441_v57  ;;  %1328 = vmatprep.subr.bf16.mxu0 %v1442_v58 }
  0x36   :  { %1350 = vmatprep.subr.bf16.mxu1 %v1443_v59 }
  0x38   :  { %1329 = vmatpush3.bf16.msra.mxu0 %v1444_v60 }
  0x39   :  { %1351 = vmatpush3.bf16.msra.mxu1 %v1445_v61  ;;  %1330 = vmatprep.subr.bf16.mxu0 %v1446_v62 }
  0x3a   :  { %1352 = vmatprep.subr.bf16.mxu1 %v1447_v63 }
  0x3c   :  { %1331 = vmatpush3.bf16.msra.mxu0 %v1448_v0 }
  0x3d   :  { %1353 = vmatpush3.bf16.msra.mxu1 %v1449_v1  ;;  %1332 = vmatprep.subr.bf16.mxu0 %v1450_v2 }
  0x3e   :  { %1354 = vmatprep.subr.bf16.mxu1 %v1451_v3 }
  0x40   :  { %1333 = vmatpush3.bf16.msra.mxu0 %v1452_v4 }
  0x41   :  { %1355 = vmatpush3.bf16.msra.mxu1 %v1453_v5 }
  0x43   :  { %704 = vmatmul.mubr.bf16.vlgmr.msra.gmra.mrb[4].mxu0 %v1173_v7 }
  0x44   :  { %744 = vmatmul.mubr.bf16.vlgmr.msra.gmra.mrb[4].mxu1 %v1175_v10 }
  0x45   :  { %14 = vsyncpa [#allocation4], 0  ;;  %v1458_v12 = vld [vmem:[%s1908_s3] ss:$8 sps:$4 sm:$0xff]   ;;  %v1460_v13 = vld [vmem:[%s1908_s3 + $0x4] ss:$8 sps:$4 sm:$0xff]   ;;  %v776_v7 = vlaneseq }
  0x46   :  { %v1463_v14 = vld [vmem:[%s1908_s3 + $0x14] ss:$8 sps:$4 sm:$0xff]   ;;  %866 = vmatprep.subr.bf16.mxu0 %v1460_v13  ;;  %v1461_v15 = vld [vmem:[%s1908_s3 + $0x10] ss:$8 sps:$4 sm:$0xff]   ;;  %v1466_v16 = vld [vmem:[%s1908_s3 + $0x24] ss:$8 sps:$4 sm:$0xff]  }
  0x47   :  { %867 = vmatpush1.bf16.msra.mxu0 %v1458_v12  ;;  %v1464_v17 = vld [vmem:[%s1908_s3 + $0x20] ss:$8 sps:$4 sm:$0xff]   ;;  %v1469_v18 = vld [vmem:[%s1908_s3 + $0x34] ss:$8 sps:$4 sm:$0xff]   ;;  %v1467_v19 = vld [vmem:[%s1908_s3 + $0x30] ss:$8 sps:$4 sm:$0xff]  }
  0x48   :  { %868 = vmatprep.subr.bf16.mxu0 %v1463_v14  ;;  %v1472_v20 = vld [vmem:[%s1908_s3 + $0x44] ss:$8 sps:$4 sm:$0xff]   ;;  %v1470_v21 = vld [vmem:[%s1908_s3 + $0x40] ss:$8 sps:$4 sm:$0xff]   ;;  %v1475_v22 = vld [vmem:[%s1908_s3 + $0x54] ss:$8 sps:$4 sm:$0xff]  }
  0x49   :  { %v1473_v23 = vld [vmem:[%s1908_s3 + $0x50] ss:$8 sps:$4 sm:$0xff]   ;;  %v1478_v24 = vld [vmem:[%s1908_s3 + $0x64] ss:$8 sps:$4 sm:$0xff]   ;;  %v1476_v25 = vld [vmem:[%s1908_s3 + $0x60] ss:$8 sps:$4 sm:$0xff]  }
  0x4a   :  { %v1481_v26 = vld [vmem:[%s1908_s3 + $0x74] ss:$8 sps:$4 sm:$0xff]   ;;  %v1479_v27 = vld [vmem:[%s1908_s3 + $0x70] ss:$8 sps:$4 sm:$0xff]   ;;  %v1526_v28 = vmov 0   ;;  %v1482_v55 = vld [vmem:[%s1912_s7 + $0x40] sm:$0xff]  }
  0x4b   :  { %869 = vmatpush1.bf16.msra.mxu0 %v1461_v15  ;;  %898 = vmatprep.mubr.bf16.mxu0 %v1526_v28  ;;  %v1168_v51 = vld [vmem:[%s1907_s2] ss:$0 sm:$0xff]  ;;  %v1484_v57 = vld [vmem:[%s1912_s7 + $0x48] sm:$0xff]   ;;  %v1486_v59 = vld [vmem:[%s1912_s7 + $0x50] sm:$0xff]   ;;  %v777_v8 = vshrl.u32 %v776_v7, 7  ;;  %s1527_s16 = smov [#allocation3]  }
  0x4c   :  { %870 = vmatprep.subr.bf16.mxu0 %v1466_v16  ;;  %v1483_v56 = vld [vmem:[%s1912_s7] sm:$0xff]   ;;  %1362 = vmatprep.subr.bf16.mxu1 %v1482_v55  ;;  %v1485_v58 = vld [vmem:[%s1912_s7 + $0x8] sm:$0xff]   ;;  %v1487_v60 = vld [vmem:[%s1912_s7 + $0x10] sm:$0xff]   ;;  %s1160_s17 = sshll.u32 %s1527_s16, 4  ;;  %s1161_s17 = int_to_ptr.vmem [resolvable:$true] %s1160_s17 }
  0x4d   :  { %1363 = vmatpush3.bf16.msra.mxu1 %v1483_v56  ;;  %v1488_v61 = vld [vmem:[%s1912_s7 + $0x58] sm:$0xff]   ;;  %v1490_v63 = vld [vmem:[%s1912_s7 + $0x60] sm:$0xff]   ;;  %v1492_v1 = vld [vmem:[%s1912_s7 + $0x68] sm:$0xff]   ;;  %v778_v9 = vsub.s32 0, %v777_v8  ;;  %v782_v11 = vsub.s32 1, %v777_v8  ;;  %s1502_s18 = scalar_lea.vmem %s1161_s17, 128  ;;  %p1507_p1 = scmp.lt.s32.totalorder %s1161_s17, %s1161_s17 }
  0x4e   :  { %1364 = vmatprep.subr.bf16.mxu1 %v1484_v57  ;;  %v1489_v62 = vld [vmem:[%s1912_s7 + $0x18] sm:$0xff]   ;;  %v1491_v0 = vld [vmem:[%s1912_s7 + $0x20] sm:$0xff]   ;;  %v1493_v2 = vld [vmem:[%s1912_s7 + $0x28] sm:$0xff]   ;;  %p1503_p0 = scmp.ne.s32.totalorder %s1161_s17, %s1502_s18  ;;  %p1508_p2 = scmp.lt.s32.totalorder %s1502_s18, %s1502_s18 }
  0x4f   :  { %871 = vmatpush1.bf16.msra.mxu0 %v1464_v17  ;;  %v1494_v3 = vld [vmem:[%s1912_s7 + $0x70] sm:$0xff]   ;;  %v1496_v5 = vld [vmem:[%s1912_s7 + $0x78] sm:$0xff]   ;;  %v774_v10 = vld [vmem:[%s1909_s4] sm:$0x3] }
  0x50   :  { %872 = vmatprep.subr.bf16.mxu0 %v1469_v18  ;;  %v1495_v4 = vld [vmem:[%s1912_s7 + $0x30] sm:$0xff]   ;;  %v1497_v6 = vld [vmem:[%s1912_s7 + $0x38] sm:$0xff]   ;;  %v779_v12 = vrot.slane %v774_v10, %v778_v9  ;;  %v783_v13 = vrot.slane %v774_v10, %v782_v11  ;;  %v960_v55 = vld [vmem:[%s1911_s6] sm:$0x3]  ;;  %p1509_p3 = por %p1508_p2, %p1507_p1 }
  0x51   :  { %1365 = vmatpush3.bf16.msra.mxu1 %v1485_v58 }
  0x52   :  { %1366 = vmatprep.subr.bf16.mxu1 %v1486_v59  ;;  %p1510_p4 = pnand %p1509_p3, %p1503_p0 }
  0x53   :  { %873 = vmatpush1.bf16.msra.mxu0 %v1467_v19 }
  0x54   :  { %874 = vmatprep.subr.bf16.mxu0 %v1472_v20 }
  0x55   :  { %1367 = vmatpush3.bf16.msra.mxu1 %v1487_v60 }
  0x56   :  { %1368 = vmatprep.subr.bf16.mxu1 %v1488_v61  ;;  %v965_v61 = vrot.slane %v960_v55, %v778_v9 }
  0x57   :  { %875 = vmatpush1.bf16.msra.mxu0 %v1470_v21 }
  0x58   :  { %876 = vmatprep.subr.bf16.mxu0 %v1475_v22 }
  0x59   :  { %1369 = vmatpush3.bf16.msra.mxu1 %v1489_v62 }
  0x5a   :  { %1370 = vmatprep.subr.bf16.mxu1 %v1490_v63  ;;  %v969_v63 = vrot.slane %v960_v55, %v782_v11 }
  0x5b   :  { %877 = vmatpush1.bf16.msra.mxu0 %v1473_v23 }
  0x5c   :  { %878 = vmatprep.subr.bf16.mxu0 %v1478_v24 }
  0x5d   :  { %1371 = vmatpush3.bf16.msra.mxu1 %v1491_v0 }
  0x5e   :  { %1372 = vmatprep.subr.bf16.mxu1 %v1492_v1 }
  0x5f   :  { %879 = vmatpush1.bf16.msra.mxu0 %v1476_v25 }
  0x60   :  { %880 = vmatprep.subr.bf16.mxu0 %v1481_v26 }
  0x61   :  { %1373 = vmatpush3.bf16.msra.mxu1 %v1493_v2 }
  0x62   :  { %1374 = vmatprep.subr.bf16.mxu1 %v1494_v3 }
  0x63   :  { %881 = vmatpush1.bf16.msra.mxu0 %v1479_v27 }
  0x65   :  { %1375 = vmatpush3.bf16.msra.mxu1 %v1495_v4 }
  0x66   :  { %1376 = vmatprep.subr.bf16.mxu1 %v1496_v5 }
  0x69   :  { %1377 = vmatpush3.bf16.msra.mxu1 %v1497_v6 }
  0xf6   :  { %v1290_v29 = vpop.f32.mrb[0].mxu0 }
  0xf7   :  { %v1312_v30 = vpop.f32.mrb[0].mxu1  ;;  %v1291_v31 = vpop.f32.mrb[1].mxu0 }
  0xf8   :  { %v1313_v32 = vpop.f32.mrb[1].mxu1  ;;  %v1292_v33 = vadd.f32 %v1291_v31, %v1290_v29  ;;  %v1293_v35 = vpop.f32.mrb[2].mxu0 }
  0xf9   :  { %v1314_v34 = vadd.f32 %v1313_v32, %v1312_v30  ;;  %v1315_v36 = vpop.f32.mrb[2].mxu1  ;;  %v1294_v37 = vpop.f32.mrb[3].mxu0 }
  0xfa   :  { %v1316_v38 = vpop.f32.mrb[3].mxu1 }
  0xfb   :  { %v666_v39 = vadd.f32 %v1314_v34, %v1292_v33 }
 0x116   :  { %v1334_v40 = vpop.f32.mrb[4].mxu0 }
 0x117   :  { %v1356_v41 = vpop.f32.mrb[4].mxu1  ;;  %v1335_v42 = vpop.f32.mrb[5].mxu0 }
 0x118   :  { %v1357_v43 = vpop.f32.mrb[5].mxu1  ;;  %v1336_v44 = vadd.f32 %v1335_v42, %v1334_v40  ;;  %v1337_v46 = vpop.f32.mrb[6].mxu0 }
 0x119   :  { %v1358_v45 = vadd.f32 %v1357_v43, %v1356_v41  ;;  %v1359_v47 = vpop.f32.mrb[6].mxu1  ;;  %v1338_v48 = vpop.f32.mrb[7].mxu0 }
 0x11a   :  { %v1360_v49 = vpop.f32.mrb[7].mxu1  ;;  %v706_v50 = vadd.f32 %v1336_v44, %v666_v39 }
 0x11c   :  { %v746_v52 = vadd.f32 %v1358_v45, %v706_v50 }
 0x11e   :  { %v751_v53 = vadd.f32 %v1168_v51, %v746_v52 }
 0x120   :  { %v757_v54 = vpack.c.bf16 %v751_v53, %v751_v53 }
 0x122   :  { %899 = vmatmul.mubr.bf16.vlgmr.msra.gmra.mrb[8].mxu0 %v757_v54  ;;  %v946_v54 = vld [vmem:[%s1910_s5] sm:$0x3] }
 0x123   :  { %v951_v56 = vrot.slane %v946_v54, %v778_v9  ;;  %v955_v58 = vrot.slane %v946_v54, %v782_v11 }
 0x1f5   :  { %v900_v14 = vpop.f32.mrb[8].mxu0 }
 0x1f6   :  { %v901_v15 = vadd.f32 %v900_v14, %v779_v12  ;;  %v902_v16 = vpop.f32.mrb[9].mxu0  ;;  %v1257_v12 = vld [vmem:[%s1913_s8] ss:$0 sm:$0xff] }
 0x1f7   :  { %v903_v17 = vadd.f32 %v902_v16, %v783_v13  ;;  %v904_v18 = vpop.f32.mrb[10].mxu0 }
 0x1f8   :  { %v907_v19 = vrot.slane %v901_v15, 4  ;;  %v905_v20 = vpop.f32.mrb[11].mxu0 }
 0x1f9   :  { %v913_v21 = vrot.slane %v903_v17, 4 }
 0x1fa   :  { %v908_v22 = vadd.f32 %v907_v19, %v901_v15 }
 0x1fb   :  { %v914_v23 = vadd.f32 %v913_v21, %v903_v17 }
 0x1fc   :  { %v909_v24 = vrot.slane %v908_v22, 2 }
 0x1fd   :  { %v915_v25 = vrot.slane %v914_v23, 2 }
 0x1fe   :  { %v910_v26 = vadd.f32 %v909_v24, %v908_v22 }
 0x1ff   :  { %v916_v27 = vadd.f32 %v915_v25, %v914_v23 }
 0x200   :  { %v911_v28 = vrot.slane %v910_v26, 1 }
 0x201   :  { %v917_v29 = vrot.slane %v916_v27, 1 }
 0x202   :  { %v912_v30 = vadd.f32 %v911_v28, %v910_v26 }
 0x203   :  { %v918_v31 = vadd.f32 %v917_v29, %v916_v27 }
 0x204   :  { %v920_v32 = vmul.f32 0.125, %v912_v30 }
 0x205   :  { %v921_v33 = vmul.f32 0.125, %v918_v31 }
 0x206   :  { %v922_v34 = vsub.f32 %v901_v15, %v920_v32 }
 0x207   :  { %v923_v35 = vsub.f32 %v903_v17, %v921_v33 }
 0x208   :  { %v924_v36 = vmul.f32 %v922_v34, %v922_v34 }
 0x209   :  { %v925_v37 = vmul.f32 %v923_v35, %v923_v35 }
 0x20a   :  { %v926_v38 = vrot.slane %v924_v36, 4 }
 0x20b   :  { %v932_v39 = vrot.slane %v925_v37, 4 }
 0x20c   :  { %v927_v40 = vadd.f32 %v926_v38, %v924_v36 }
 0x20d   :  { %v933_v41 = vadd.f32 %v932_v39, %v925_v37 }
 0x20e   :  { %v928_v42 = vrot.slane %v927_v40, 2 }
 0x20f   :  { %v934_v43 = vrot.slane %v933_v41, 2 }
 0x210   :  { %v929_v44 = vadd.f32 %v928_v42, %v927_v40 }
 0x211   :  { %v935_v45 = vadd.f32 %v934_v43, %v933_v41 }
 0x212   :  { %v930_v46 = vrot.slane %v929_v44, 1 }
 0x213   :  { %v936_v47 = vrot.slane %v935_v45, 1 }
 0x214   :  { %v931_v48 = vadd.f32 %v930_v46, %v929_v44 }
 0x215   :  { %v937_v49 = vadd.f32 %v936_v47, %v935_v45 }
 0x216   :  { %v938_v50 = vmul.f32 0.125, %v931_v48 }
 0x217   :  { %v939_v51 = vmul.f32 0.125, %v937_v49 }
 0x218   :  { %v940_v52 = vadd.f32 1e-05, %v938_v50 }
 0x219   :  { %v941_v53 = vadd.f32 1e-05, %v939_v51 }
 0x21a   :  { %1498 = vrsqrt.f32 %v940_v52 }
 0x21b   :  { %1500 = vrsqrt.f32 %v941_v53 }
 0x224   :  { %v1499_v57 = vpop.eup %1498 }
 0x225   :  { %v1501_v59 = vpop.eup %1500  ;;  %v944_v60 = vmul.f32 %v1499_v57, %v922_v34 }
 0x226   :  { %v945_v62 = vmul.f32 %v1501_v59, %v923_v35 }
 0x227   :  { %v958_v0 = vmul.f32 %v951_v56, %v944_v60 }
 0x228   :  { %v959_v1 = vmul.f32 %v955_v58, %v945_v62 }
 0x229   :  { %v972_v2 = vadd.f32 %v965_v61, %v958_v0 }
 0x22a   :  { %v973_v3 = vadd.f32 %v969_v63, %v959_v1 }
 0x22b   :  { %v974_v4 = vmax.f32 %v972_v2, 0.0 }
 0x22c   :  { %v975_v5 = vmax.f32 %v973_v3, 0.0 }
 0x22d   :  { %v976_v7 = vpack.c.bf16 %v974_v4, %v974_v4 }
 0x22e   :  { %v977_v6 = vpack.c.bf16 %v975_v5, %v975_v5 }
 0x230   :  { %1145 = vmatprep.mubr.bf16.mxu1 %v977_v6 }
 0x231   :  { %1146 = vmatmul.mubr.bf16.vlgmr.msra.gmra.mrb[8].mxu1 %v976_v7 }
 0x304   :  { %v1378_v8 = vpop.f32.mrb[8].mxu1 }
 0x305   :  { %v1379_v10 = vpop.f32.mrb[9].mxu1 }
 0x306   :  { %v1380_v9 = vadd.f32 %v1379_v10, %v1378_v8  ;;  %v1381_v11 = vpop.f32.mrb[10].mxu1 }
 0x307   :  { %v1382_v13 = vpop.f32.mrb[11].mxu1 }
 0x308   :  { %v1148_v14 = vadd.f32 %v1380_v9, %v1257_v12 }
 0x30a   :  { %1153 = vst [vmem:[#allocation3] sm:$0xff] %v1148_v14 }
 0x30b   :  { %1513 = shalt.err (!%p1510_p4)
}
 0x30c   :  { %s1514_s20 = scalar_lea.hbm %s1914_s9, 128 }
 0x30d   :  { %p1515_p5 = scmp.ne.s32.totalorder %s1914_s9, %s1514_s20  ;;  %p1518_p6 = scmp.lt.u32.totalorder %s1514_s20, %s1914_s9 }
 0x30f   :  { %p1520_p7 = pnand %p1518_p6, %p1515_p5 }
 0x311   :  { %1523 = shalt.err (!%p1520_p7)
}
 0x312   :  { %1163 = dma.vmem_to_hbm [thread:$0]  %s1161_s17, 128, %s1914_s9, [#allocation4]  }
 0x313   :  { %1524 = dma.done.wait [#allocation4], 128  }
 0x314   :  { %1525 = vsyncadd [#allocation4], 4294967168 }
 0x315   :  { %1167 = vsyncpa [#allocation4], 1 }

</bundles_post_ra>
